<compile_context>
chip_gen: v6e
topology: v6e:2x2x1
jax: 0.10.0
libtpu: 0.0.40
codegen_flags: <defaults>
</compile_context>

<pallas_src>
import functools
import math

import jax
import jax.numpy as jnp
from jax.experimental import pallas as pl
from jax.experimental.pallas import tpu as pltpu

_INV_SQRT2 = 1.0 / math.sqrt(2.0)


# --------------------------------------------------------------------------- #
# small math helpers (used both inside the kernel and by the references)      #
# --------------------------------------------------------------------------- #
def _gelu(x, approximate=False):
    if approximate:
        return jax.nn.gelu(x, approximate=True)            # tanh approx -> EUP slot
    return 0.5 * x * (1.0 + jax.lax.erf(x * _INV_SQRT2))    # exact (torch default)


def _layer_norm(y, gamma, beta, eps):
    mean = jnp.mean(y, axis=-1, keepdims=True)
    var = jnp.mean(jnp.square(y - mean), axis=-1, keepdims=True)
    return (y - mean) * jax.lax.rsqrt(var + eps) * gamma + beta


# --------------------------------------------------------------------------- #
# fused FFN Pallas kernel                                                      #
# --------------------------------------------------------------------------- #
def _ffn_kernel(*refs, eps, has_fusion, approximate_gelu):
    if has_fusion:
        (x_ref, f_ref, wd_ref, bd_ref, wf_ref, bf_ref,
         wo_ref, bo_ref, gm_ref, bt_ref, o_ref) = refs
    else:
        (x_ref, wd_ref, bd_ref, wo_ref, bo_ref, gm_ref, bt_ref, o_ref) = refs

    x = x_ref[...]
    # BertIntermediate: dense (+ fusion_dense) with f32 accumulation on the MXU.
    h = jnp.dot(x, wd_ref[...], preferred_element_type=jnp.float32)
    h = h + bd_ref[...].astype(jnp.float32)
    if has_fusion:
        h = h + jnp.dot(f_ref[...], wf_ref[...], preferred_element_type=jnp.float32)
        h = h + bf_ref[...].astype(jnp.float32)
    g = _gelu(h, approximate_gelu)

    # BertOutput: dense + bias + residual + LayerNorm (dropout = inference no-op).
    y = jnp.dot(g.astype(wo_ref.dtype), wo_ref[...],
                preferred_element_type=jnp.float32)
    y = y + bo_ref[...].astype(jnp.float32) + x.astype(jnp.float32)
    mean = jnp.mean(y, axis=-1, keepdims=True)
    var = jnp.mean(jnp.square(y - mean), axis=-1, keepdims=True)
    yn = (y - mean) * jax.lax.rsqrt(var + eps)
    o_ref[...] = (yn * gm_ref[...].astype(jnp.float32)
                  + bt_ref[...].astype(jnp.float32)).astype(o_ref.dtype)


# --------------------------------------------------------------------------- #
# tiling / VMEM helpers                                                        #
# --------------------------------------------------------------------------- #
def _round_up(x, m):
    return ((x + m - 1) // m) * m


def _sublane_align(dtype):
    # 8 rows for 32-bit, 16 for bf16, 32 for int8 (sublane packing).
    return max(8, 32 // jnp.dtype(dtype).itemsize)


def _vmem_capacity_bytes():
    try:
        return int(pltpu.get_tpu_info().vmem_capacity_bytes)
    except Exception:
        return 64 * 1024 * 1024   # conservative default (v7x per-TensorCore)


# --------------------------------------------------------------------------- #
# fused feed_forward_chunk wrapper                                             #
# --------------------------------------------------------------------------- #
def bert_ffn(attention_output, params, fusion_output=None, *,
             compute_dtype=None, approximate_gelu=False, tm_target=None,
             vmem_headroom_bytes=16 * 1024 * 1024):
    """Fused BertIntermediate + BertOutput (BertLayer.feed_forward_chunk).

    attention_output: [B, S, H]; fusion_output: [B, S, H] or None.
    Weights are stored pre-transposed as [in, out] relative to torch nn.Linear.
    Dropout layers are inference no-ops.
    """
    B, S, H = attention_output.shape
    I = params["w_dense"].shape[1]
    out_dtype = attention_output.dtype
    eps = float(params.get("ln_out_eps", 1e-12))
    has_fusion = fusion_output is not None

    M = B * S
    x2d = attention_output.reshape(M, H)
    f2d = fusion_output.reshape(M, H) if has_fusion else None

    wd, wo = params["w_dense"], params["w_out"]
    bd = params["b_dense"].reshape(1, I)
    bo = params["b_out"].reshape(1, H)
    gm = params["ln_out_gamma"].reshape(1, H)
    bt = params["ln_out_beta"].reshape(1, H)
    if has_fusion:
        wf = params["w_fusion"]
        bf = params["b_fusion"].reshape(1, I)

    if compute_dtype is not None:
        x2d = x2d.astype(compute_dtype)
        wd = wd.astype(compute_dtype)
        wo = wo.astype(compute_dtype)
        if has_fusion:
            f2d = f2d.astype(compute_dtype)
            wf = wf.astype(compute_dtype)

    # ---- tile / VMEM budget selection --------------------------------------
    cap = max(_vmem_capacity_bytes() - vmem_headroom_bytes, 24 * 1024 * 1024)
    align = _sublane_align(x2d.dtype)
    if tm_target is None:
        tm_target = 512 if cap > 96 * 1024 * 1024 else 256   # 128-MiB vs 64-MiB parts

    resident = [wd, bd, wo, bo, gm, bt] + ([wf, bf] if has_fusion else [])
    w_bytes = sum(int(a.size) * a.dtype.itemsize for a in resident)
    act_row = H * x2d.dtype.itemsize * (2 if has_fusion else 1)
    out_row = H * jnp.dtype(out_dtype).itemsize

    def needed(tm):
        # double-buffered blocked operands + f32 in-kernel transients, 10% slack
        return int(1.1 * (2 * w_bytes + 2 * tm * (act_row + out_row)
                          + 2 * tm * I * 4 + 2 * tm * H * 4))

    tm = min(_round_up(tm_target, align), _round_up(M, align))
    while needed(tm) > cap and tm > align:
        tm = max(align, _round_up(tm // 2, align))
    if needed(tm) > cap:
        # TODO(synk): add a K/N-tiled fallback (streamed weights) for configs whose
        # resident weights do not fit within one TensorCore's VMEM budget.
        raise ValueError(
            f"fused FFN weights ({w_bytes} bytes, double-buffered) exceed the "
            f"{cap}-byte VMEM budget; no streamed-weight fallback implemented")

    num_m = pl.cdiv(M, tm)
    if num_m < 2 and tm > align:          # keep >=2 parallel steps for v7x megacore
        tm_alt = _round_up(pl.cdiv(M, 2), align)
        if tm_alt < tm:
            tm = tm_alt
            num_m = pl.cdiv(M, tm)
    M_pad = num_m * tm

    if M_pad != M:                        # ragged M: zero-pad instead of full-dim tile
        pad = ((0, M_pad - M), (0, 0))
        x2d = jnp.pad(x2d, pad)
        if has_fusion:
            f2d = jnp.pad(f2d, pad)

    # ---- specs ---------------------------------------------------------------
    row_spec = pl.BlockSpec((tm, H), lambda i: (i, 0))

    def const_spec(a):                    # VMEM-resident block (never re-fetched)
        return pl.BlockSpec(a.shape, lambda i: (0,) * a.ndim)

    if has_fusion:
        args = (x2d, f2d, wd, bd, wf, bf, wo, bo, gm, bt)
        in_specs = [row_spec, row_spec, const_spec(wd), const_spec(bd),
                    const_spec(wf), const_spec(bf), const_spec(wo),
                    const_spec(bo), const_spec(gm), const_spec(bt)]
    else:
        args = (x2d, wd, bd, wo, bo, gm, bt)
        in_specs = [row_spec, const_spec(wd), const_spec(bd), const_spec(wo),
                    const_spec(bo), const_spec(gm), const_spec(bt)]

    gemm_flops = 2 * M * H * I * (2 if has_fusion else 1) + 2 * M * I * H
    bytes_accessed = (sum(int(a.size) * a.dtype.itemsize for a in args)
                      + M_pad * H * jnp.dtype(out_dtype).itemsize)
    cost = pl.CostEstimate(flops=gemm_flops, transcendentals=M * I,
                           bytes_accessed=bytes_accessed)

    kernel = functools.partial(_ffn_kernel, eps=eps, has_fusion=has_fusion,
                               approximate_gelu=approximate_gelu)

    out = pl.pallas_call(
        kernel,
        out_shape=jax.ShapeDtypeStruct((M_pad, H), out_dtype),
        grid_spec=pl.GridSpec(
            grid=(num_m,),
            in_specs=in_specs,
            out_specs=pl.BlockSpec((tm, H), lambda i: (i, 0)),
        ),
        compiler_params=pltpu.CompilerParams(
            dimension_semantics=("parallel",),
            vmem_limit_bytes=int(cap),
        ),
        cost_estimate=cost,
    )(*args)

    return out[:M].reshape(B, S, H)


# --------------------------------------------------------------------------- #
# full BertLayer forward (attention stages in plain JAX)                       #
# --------------------------------------------------------------------------- #
def _attention_jax(hidden_states, params, attention_mask=None,
                   visual_hidden_state=None):
    # TODO(synk): port BertSelfAttention/BertSelfOutput/BertFusion to a Pallas
    # flash-attention kernel; currently plain JAX (dropout = inference no-op).
    B, S, H = hidden_states.shape
    nh = int(params["num_attention_heads"])
    dh = H // nh
    eps = float(params.get("ln_attn_eps", 1e-12))

    def heads(x):
        return x.reshape(B, S, nh, dh).transpose(0, 2, 1, 3)

    q = heads(jnp.dot(hidden_states, params["w_q"]) + params["b_q"])
    k = heads(jnp.dot(hidden_states, params["w_k"]) + params["b_k"])
    v = heads(jnp.dot(hidden_states, params["w_v"]) + params["b_v"])

    scores = jnp.einsum("bhqd,bhkd->bhqk", q, k) / math.sqrt(dh)
    if attention_mask is not None:
        scores = scores + attention_mask
    probs = jax.nn.softmax(scores, axis=-1)
    ctx = jnp.einsum("bhqk,bhkd->bhqd", probs, v)
    ctx = ctx.transpose(0, 2, 1, 3).reshape(B, S, H)

    fusion_output = None
    if visual_hidden_state is not None:            # BertFusion ('softmax')
        fscores = jnp.einsum("bsh,bvh->bsv", ctx, visual_hidden_state)
        fprobs = jax.nn.softmax(fscores, axis=-1)
        fusion_output = jnp.einsum("bsv,bvh->bsh", fprobs, visual_hidden_state)

    ao = jnp.dot(ctx, params["w_attn_out"]) + params["b_attn_out"]
    attn_out = _layer_norm(ao + hidden_states, params["ln_attn_gamma"],
                           params["ln_attn_beta"], eps)
    return attn_out, fusion_output


def bert_layer(hidden_states, params, attention_mask=None,
               visual_hidden_state=None, **ffn_kwargs):
    attn_out, fusion_output = _attention_jax(hidden_states, params,
                                             attention_mask, visual_hidden_state)
    return bert_ffn(attn_out, params, fusion_output, **ffn_kwargs)


# --------------------------------------------------------------------------- #
# params / references                                                          #
# --------------------------------------------------------------------------- #
def init_params(key, hidden_size, intermediate_size, num_attention_heads,
                dtype=jnp.float32):
    H, I = hidden_size, intermediate_size
    ks = iter(jax.random.split(key, 18))
    sh, si = 1.0 / math.sqrt(H), 1.0 / math.sqrt(I)

    def u(shape, s):
        return jax.random.uniform(next(ks), shape, dtype, -s, s)

    return {
        "num_attention_heads": num_attention_heads,
        # BertSelfAttention (weights stored [in, out], transposed vs nn.Linear)
        "w_q": u((H, H), sh), "b_q": u((H,), sh),
        "w_k": u((H, H), sh), "b_k": u((H,), sh),
        "w_v": u((H, H), sh), "b_v": u((H,), sh),
        # BertSelfOutput
        "w_attn_out": u((H, H), sh), "b_attn_out": u((H,), sh),
        "ln_attn_gamma": jnp.ones((H,), dtype) + u((H,), 0.1),
        "ln_attn_beta": u((H,), 0.1),
        "ln_attn_eps": 1e-12,
        # BertIntermediate
        "w_dense": u((H, I), sh), "b_dense": u((I,), sh),
        "w_fusion": u((H, I), sh), "b_fusion": u((I,), sh),
        # BertOutput
        "w_out": u((I, H), si), "b_out": u((H,), si),
        "ln_out_gamma": jnp.ones((H,), dtype) + u((H,), 0.1),
        "ln_out_beta": u((H,), 0.1),
        "ln_out_eps": 1e-12,
    }


def _ffn_reference(attention_output, params, fusion_output=None):
    hp = jax.lax.Precision.HIGHEST
    h = jnp.dot(attention_output, params["w_dense"], precision=hp) + params["b_dense"]
    if fusion_output is not None:
        h = h + jnp.dot(fusion_output, params["w_fusion"], precision=hp) + params["b_fusion"]
    g = _gelu(h)
    y = jnp.dot(g, params["w_out"], precision=hp) + params["b_out"] + attention_output
    return _layer_norm(y, params["ln_out_gamma"], params["ln_out_beta"],
                       float(params["ln_out_eps"]))


def _layer_reference(hidden_states, params, attention_mask=None,
                     visual_hidden_state=None):
    attn_out, fusion_output = _attention_jax(hidden_states, params,
                                             attention_mask, visual_hidden_state)
    return _ffn_reference(attn_out, params, fusion_output)


# --------------------------------------------------------------------------- #
# self-test                                                                    #
# --------------------------------------------------------------------------- #
if __name__ == "__main__":
    key = jax.random.PRNGKey(0)
    k_h, k_f, k_p, k_v, k_h2, k_f2, k_p2 = jax.random.split(key, 7)

    # --- small shapes consistent with the module ---
    B, S, H, I, NH, SV = 2, 8, 32, 128, 4, 6
    params = init_params(k_p, H, I, NH)
    hidden_states = jax.random.normal(k_h, (B, S, H), jnp.float32)
    fusion_output = jax.random.normal(k_f, (B, S, H), jnp.float32)
    visual_hidden_state = jax.random.normal(k_v, (B, SV, H), jnp.float32)

    # 1) fused FFN kernel (BertIntermediate + BertOutput), with fusion stream
    out = jax.block_until_ready(bert_ffn(hidden_states, params, fusion_output))
    ref = _ffn_reference(hidden_states, params, fusion_output)
    assert out.shape == (B, S, H)
    assert jnp.allclose(out, ref, atol=2e-4, rtol=2e-4)

    # 2) fusion_output=None fast path (single GEMM, no W_fusion HBM stream)
    out_nf = jax.block_until_ready(bert_ffn(hidden_states, params, None))
    ref_nf = _ffn_reference(hidden_states, params, None)
    assert jnp.allclose(out_nf, ref_nf, atol=2e-4, rtol=2e-4)

    # 3) bf16-MXU compute path (accuracy-gated option), f32 accumulate/epilogue
    out_bf16 = jax.block_until_ready(
        bert_ffn(hidden_states, params, fusion_output, compute_dtype=jnp.bfloat16))
    assert bool(jnp.all(jnp.isfinite(out_bf16)))
    assert jnp.allclose(out_bf16, ref, atol=0.25, rtol=0.25)

    # 4) full BertLayer forward (attention in plain JAX, FFN via the Pallas kernel)
    mask = jnp.zeros((B, 1, 1, S), jnp.float32).at[:, :, :, -1].set(-10000.0)
    layer_out = jax.block_until_ready(
        bert_layer(hidden_states, params, attention_mask=mask,
                   visual_hidden_state=visual_hidden_state))
    layer_ref = _layer_reference(hidden_states, params, attention_mask=mask,
                                 visual_hidden_state=visual_hidden_state)
    assert layer_out.shape == (B, S, H)
    assert jnp.allclose(layer_out, layer_ref, atol=2e-4, rtol=2e-4)

    # 5) larger ragged-M case: multi-tile grid + zero-padding path
    B2, S2, H2, I2 = 2, 100, 64, 512
    params2 = init_params(k_p2, H2, I2, 8)
    hs2 = jax.random.normal(k_h2, (B2, S2, H2), jnp.float32)
    fo2 = jax.random.normal(k_f2, (B2, S2, H2), jnp.float32)
    out2 = jax.block_until_ready(bert_ffn(hs2, params2, fo2, tm_target=64))
    ref2 = _ffn_reference(hs2, params2, fo2)
    assert jnp.allclose(out2, ref2, atol=5e-4, rtol=5e-4)

    print("KERNEL_OK")
</pallas_src>

<mosaic_0001>
module attributes {stable_mosaic.version = 11 : i64} {
  func.func @_ffn_kernel(%arg0: i32, %arg1: memref<8x32xf32, #tpu.memory_space<vmem>>, %arg2: memref<8x32xf32, #tpu.memory_space<vmem>>, %arg3: memref<32x128xf32, #tpu.memory_space<vmem>>, %arg4: memref<1x128xf32, #tpu.memory_space<vmem>>, %arg5: memref<32x128xf32, #tpu.memory_space<vmem>>, %arg6: memref<1x128xf32, #tpu.memory_space<vmem>>, %arg7: memref<128x32xf32, #tpu.memory_space<vmem>>, %arg8: memref<1x32xf32, #tpu.memory_space<vmem>>, %arg9: memref<1x32xf32, #tpu.memory_space<vmem>>, %arg10: memref<1x32xf32, #tpu.memory_space<vmem>>, %arg11: memref<8x32xf32, #tpu.memory_space<vmem>>) attributes {dimension_semantics = [#tpu.dimension_semantics<parallel>], iteration_bounds = array<i64: 2>, scalar_prefetch = 0 : i64, scratch_operands = 0 : i64, tpu.core_type = #tpu.core_type<tc>, window_params = [{transform_indices = @transform_0, window_bounds = array<i64: 8, 32>}, {transform_indices = @transform_1, window_bounds = array<i64: 8, 32>}, {pipeline_mode = #tpu.pipeline_mode<synchronous>, transform_indices = @transform_2, window_bounds = array<i64: 32, 128>}, {pipeline_mode = #tpu.pipeline_mode<synchronous>, transform_indices = @transform_3, window_bounds = array<i64: 1, 128>}, {pipeline_mode = #tpu.pipeline_mode<synchronous>, transform_indices = @transform_4, window_bounds = array<i64: 32, 128>}, {pipeline_mode = #tpu.pipeline_mode<synchronous>, transform_indices = @transform_5, window_bounds = array<i64: 1, 128>}, {pipeline_mode = #tpu.pipeline_mode<synchronous>, transform_indices = @transform_6, window_bounds = array<i64: 128, 32>}, {pipeline_mode = #tpu.pipeline_mode<synchronous>, transform_indices = @transform_7, window_bounds = array<i64: 1, 32>}, {pipeline_mode = #tpu.pipeline_mode<synchronous>, transform_indices = @transform_8, window_bounds = array<i64: 1, 32>}, {pipeline_mode = #tpu.pipeline_mode<synchronous>, transform_indices = @transform_9, window_bounds = array<i64: 1, 32>}, {transform_indices = @transform_10, window_bounds = array<i64: 8, 32>}]} {
    %c0 = arith.constant 0 : index
    %c0_0 = arith.constant 0 : index
    %0 = vector.load %arg1[%c0, %c0_0] : memref<8x32xf32, #tpu.memory_space<vmem>>, vector<8x32xf32>
    %c0_1 = arith.constant 0 : index
    %c0_2 = arith.constant 0 : index
    %1 = vector.load %arg3[%c0_1, %c0_2] : memref<32x128xf32, #tpu.memory_space<vmem>>, vector<32x128xf32>
    %cst = arith.constant dense<0.000000e+00> : vector<8x128xf32>
    %2 = tpu.matmul %0, %1, %cst {dimension_numbers = #tpu.dot_dimension_numbers<[1], [0], [0], [1], [0, 0, 1, 1], [], []>} : vector<8x32xf32>, vector<32x128xf32>, vector<8x128xf32> -> vector<8x128xf32>
    %c0_3 = arith.constant 0 : index
    %c0_4 = arith.constant 0 : index
    %3 = vector.load %arg4[%c0_3, %c0_4] : memref<1x128xf32, #tpu.memory_space<vmem>>, vector<1x128xf32>
    %4 = vector.broadcast %3 : vector<1x128xf32> to vector<8x128xf32>
    %5 = arith.addf %2, %4 : vector<8x128xf32>
    %c0_5 = arith.constant 0 : index
    %c0_6 = arith.constant 0 : index
    %6 = vector.load %arg2[%c0_5, %c0_6] : memref<8x32xf32, #tpu.memory_space<vmem>>, vector<8x32xf32>
    %c0_7 = arith.constant 0 : index
    %c0_8 = arith.constant 0 : index
    %7 = vector.load %arg5[%c0_7, %c0_8] : memref<32x128xf32, #tpu.memory_space<vmem>>, vector<32x128xf32>
    %cst_9 = arith.constant dense<0.000000e+00> : vector<8x128xf32>
    %8 = tpu.matmul %6, %7, %cst_9 {dimension_numbers = #tpu.dot_dimension_numbers<[1], [0], [0], [1], [0, 0, 1, 1], [], []>} : vector<8x32xf32>, vector<32x128xf32>, vector<8x128xf32> -> vector<8x128xf32>
    %9 = arith.addf %5, %8 : vector<8x128xf32>
    %c0_10 = arith.constant 0 : index
    %c0_11 = arith.constant 0 : index
    %10 = vector.load %arg6[%c0_10, %c0_11] : memref<1x128xf32, #tpu.memory_space<vmem>>, vector<1x128xf32>
    %11 = vector.broadcast %10 : vector<1x128xf32> to vector<8x128xf32>
    %12 = arith.addf %9, %11 : vector<8x128xf32>
    %cst_12 = arith.constant 5.000000e-01 : f32
    %13 = vector.broadcast %cst_12 : f32 to vector<8x128xf32>
    %14 = arith.mulf %13, %12 : vector<8x128xf32>
    %cst_13 = arith.constant 0.707106769 : f32
    %15 = vector.broadcast %cst_13 : f32 to vector<8x128xf32>
    %16 = arith.mulf %12, %15 : vector<8x128xf32>
    %17 = math.erf %16 : vector<8x128xf32>
    %cst_14 = arith.constant 1.000000e+00 : f32
    %18 = vector.broadcast %cst_14 : f32 to vector<8x128xf32>
    %19 = arith.addf %18, %17 : vector<8x128xf32>
    %20 = arith.mulf %14, %19 : vector<8x128xf32>
    %c0_15 = arith.constant 0 : index
    %c0_16 = arith.constant 0 : index
    %21 = vector.load %arg7[%c0_15, %c0_16] : memref<128x32xf32, #tpu.memory_space<vmem>>, vector<128x32xf32>
    %cst_17 = arith.constant dense<0.000000e+00> : vector<8x32xf32>
    %22 = tpu.matmul %20, %21, %cst_17 {dimension_numbers = #tpu.dot_dimension_numbers<[1], [0], [0], [1], [0, 0, 1, 1], [], []>} : vector<8x128xf32>, vector<128x32xf32>, vector<8x32xf32> -> vector<8x32xf32>
    %c0_18 = arith.constant 0 : index
    %c0_19 = arith.constant 0 : index
    %23 = vector.load %arg8[%c0_18, %c0_19] : memref<1x32xf32, #tpu.memory_space<vmem>>, vector<1x32xf32>
    %24 = vector.broadcast %23 : vector<1x32xf32> to vector<8x32xf32>
    %25 = arith.addf %22, %24 : vector<8x32xf32>
    %26 = arith.addf %25, %0 : vector<8x32xf32>
    %cst_20 = arith.constant dense<0.000000e+00> : vector<8xf32>
    %27 = vector.multi_reduction <add>, %26, %cst_20 [1] : vector<8x32xf32> to vector<8xf32>
    %28 = vector.shape_cast %27 : vector<8xf32> to vector<8x1xf32>
    %cst_21 = arith.constant 3.200000e+01 : f32
    %29 = vector.broadcast %cst_21 : f32 to vector<8x1xf32>
    %30 = arith.divf %28, %29 : vector<8x1xf32>
    %31 = vector.broadcast %30 : vector<8x1xf32> to vector<8x32xf32>
    %32 = arith.subf %26, %31 : vector<8x32xf32>
    %33 = arith.mulf %32, %32 : vector<8x32xf32>
    %cst_22 = arith.constant dense<0.000000e+00> : vector<8xf32>
    %34 = vector.multi_reduction <add>, %33, %cst_22 [1] : vector<8x32xf32> to vector<8xf32>
    %35 = vector.shape_cast %34 : vector<8xf32> to vector<8x1xf32>
    %cst_23 = arith.constant 3.200000e+01 : f32
    %36 = vector.broadcast %cst_23 : f32 to vector<8x1xf32>
    %37 = arith.divf %35, %36 : vector<8x1xf32>
    %38 = vector.broadcast %30 : vector<8x1xf32> to vector<8x32xf32>
    %39 = arith.subf %26, %38 : vector<8x32xf32>
    %cst_24 = arith.constant 9.99999996E-13 : f32
    %40 = vector.broadcast %cst_24 : f32 to vector<8x1xf32>
    %41 = arith.addf %37, %40 : vector<8x1xf32>
    %42 = math.rsqrt %41 : vector<8x1xf32>
    %43 = vector.broadcast %42 : vector<8x1xf32> to vector<8x32xf32>
    %44 = arith.mulf %39, %43 : vector<8x32xf32>
    %c0_25 = arith.constant 0 : index
    %c0_26 = arith.constant 0 : index
    %45 = vector.load %arg9[%c0_25, %c0_26] : memref<1x32xf32, #tpu.memory_space<vmem>>, vector<1x32xf32>
    %46 = vector.broadcast %45 : vector<1x32xf32> to vector<8x32xf32>
    %47 = arith.mulf %44, %46 : vector<8x32xf32>
    %c0_27 = arith.constant 0 : index
    %c0_28 = arith.constant 0 : index
    %48 = vector.load %arg10[%c0_27, %c0_28] : memref<1x32xf32, #tpu.memory_space<vmem>>, vector<1x32xf32>
    %49 = vector.broadcast %48 : vector<1x32xf32> to vector<8x32xf32>
    %50 = arith.addf %47, %49 : vector<8x32xf32>
    %c0_29 = arith.constant 0 : index
    %c0_30 = arith.constant 0 : index
    %51 = vector.load %arg11[%c0_29, %c0_30] : memref<8x32xf32, #tpu.memory_space<vmem>>, vector<8x32xf32>
    tpu.vector_store %arg11[%c0_29, %c0_30], %50 {strides = array<i32>} : memref<8x32xf32, #tpu.memory_space<vmem>>, vector<8x32xf32>,
    return
  }
  func.func @transform_0(%arg0: i32) -> (i32, i32) {
    %c0_i32 = arith.constant 0 : i32
    %c0_i32_0 = arith.constant 0 : i32
    return %arg0, %c0_i32 : i32, i32
  }
  func.func @transform_1(%arg0: i32) -> (i32, i32) {
    %c0_i32 = arith.constant 0 : i32
    %c0_i32_0 = arith.constant 0 : i32
    return %arg0, %c0_i32 : i32, i32
  }
  func.func @transform_2(%arg0: i32) -> (i32, i32) {
    %c0_i32 = arith.constant 0 : i32
    %c0_i32_0 = arith.constant 0 : i32
    %c0_i32_1 = arith.constant 0 : i32
    return %c0_i32, %c0_i32_0 : i32, i32
  }
  func.func @transform_3(%arg0: i32) -> (i32, i32) {
    %c0_i32 = arith.constant 0 : i32
    %c0_i32_0 = arith.constant 0 : i32
    %c0_i32_1 = arith.constant 0 : i32
    return %c0_i32, %c0_i32_0 : i32, i32
  }
  func.func @transform_4(%arg0: i32) -> (i32, i32) {
    %c0_i32 = arith.constant 0 : i32
    %c0_i32_0 = arith.constant 0 : i32
    %c0_i32_1 = arith.constant 0 : i32
    return %c0_i32, %c0_i32_0 : i32, i32
  }
  func.func @transform_5(%arg0: i32) -> (i32, i32) {
    %c0_i32 = arith.constant 0 : i32
    %c0_i32_0 = arith.constant 0 : i32
    %c0_i32_1 = arith.constant 0 : i32
    return %c0_i32, %c0_i32_0 : i32, i32
  }
  func.func @transform_6(%arg0: i32) -> (i32, i32) {
    %c0_i32 = arith.constant 0 : i32
    %c0_i32_0 = arith.constant 0 : i32
    %c0_i32_1 = arith.constant 0 : i32
    return %c0_i32, %c0_i32_0 : i32, i32
  }
  func.func @transform_7(%arg0: i32) -> (i32, i32) {
    %c0_i32 = arith.constant 0 : i32
    %c0_i32_0 = arith.constant 0 : i32
    %c0_i32_1 = arith.constant 0 : i32
    return %c0_i32, %c0_i32_0 : i32, i32
  }
  func.func @transform_8(%arg0: i32) -> (i32, i32) {
    %c0_i32 = arith.constant 0 : i32
    %c0_i32_0 = arith.constant 0 : i32
    %c0_i32_1 = arith.constant 0 : i32
    return %c0_i32, %c0_i32_0 : i32, i32
  }
  func.func @transform_9(%arg0: i32) -> (i32, i32) {
    %c0_i32 = arith.constant 0 : i32
    %c0_i32_0 = arith.constant 0 : i32
    %c0_i32_1 = arith.constant 0 : i32
    return %c0_i32, %c0_i32_0 : i32, i32
  }
  func.func @transform_10(%arg0: i32) -> (i32, i32) {
    %c0_i32 = arith.constant 0 : i32
    %c0_i32_0 = arith.constant 0 : i32
    return %arg0, %c0_i32 : i32, i32
  }
}

</mosaic_0001>

<bundles_post_ra>
// kernel: tpu_custom_call.1
= control target key start
LH: loop header
LB: loop body
LE: loop exit
PB: predicated region body
PF: predicated region fallthrough
CT: control target
= control target key end

     0   :  { %s1243_s0 = inlined_call_operand.vmem [shape: f32[16,32], index: 0, kind: input, shape index: {}]   ;;  %s1244_s1 = inlined_call_operand.vmem [shape: f32[16,32], index: 1, kind: input, shape index: {}]   ;;  %s1245_s2 = inlined_call_operand.vmem [shape: f32[32,128], index: 2, kind: input, shape index: {}]   ;;  %s1246_s3 = inlined_call_operand.vmem [shape: f32[1,128], index: 3, kind: input, shape index: {}]   ;;  %s1247_s4 = inlined_call_operand.vmem [shape: f32[32,128], index: 4, kind: input, shape index: {}]   ;;  %s1248_s5 = inlined_call_operand.vmem [shape: f32[1,128], index: 5, kind: input, shape index: {}]   ;;  %s1249_s6 = inlined_call_operand.vmem [shape: f32[128,32], index: 6, kind: input, shape index: {}]   ;;  %s1250_s7 = inlined_call_operand.vmem [shape: f32[1,32], index: 7, kind: input, shape index: {}]   ;;  %s1251_s8 = inlined_call_operand.vmem [shape: f32[1,32], index: 8, kind: input, shape index: {}]   ;;  %s1252_s9 = inlined_call_operand.vmem [shape: f32[1,32], index: 9, kind: input, shape index: {}]   ;;  %s1253_s10 = inlined_call_operand.hbm [shape: f32[16,32], index: 10, kind: output, shape index: {}]  }
   0x1   :  { %1254 = sst [smem:[#allocation5_spill]] %s1243_s0 }
   0x2   :  { %1255 = sst [smem:[#allocation6_spill]] %s1244_s1 }
   0x3   :  { %15 = vsyncpa [#allocation3], 0 }
   0x4   :  { %17 = vsyncpa [#allocation3 + $0x1], 0  ;;  %s1027_s13 = smov 0   ;;  %s1029_s14 = smov 0  }
   0x5   :  { %s1031_s15 = smov 0   ;;  %s1033_s16 = smov 0  }
   0x6 LB: > { %s1048_s17 = sadd.s32 4294967295, %s967_s16   ;;  %s760_s18 = sadd.s32 4294967294, %s967_s16   ;;  %s967_s16 = sphi %s1033_s16, %s1263_s16   ;;  %s963_s15 = sphi %s1031_s15, %s1262_s15   ;;  %s959_s14 = sphi %s1029_s14, %s1261_s14   ;;  %s955_s13 = sphi %s1027_s13, %s1260_s13  }
   0x7   : > { %s1052_s19 = sadd.s32 1, %s967_s16   ;;  %s250_s20 = sadd.s32 1, %s963_s15 }
   0x8   : > { %s247_s21 = ssub.s32 %s967_s16, %s1052_s19  ;;  %p260_p0 = scmp.ne.s32.totalorder %s963_s15, %s959_s14 }
   0x9   : > { %p248_p1 = scmp.eq.s32.totalorder %s247_s21, 0  ;;  %p261_p2 = scmp.eq.s32.totalorder %s1048_s17, 1 }
   0xa   : > { %p266_p3 = scmp.ne.s32.totalorder %s959_s14, %s955_s13  ;;  %p267_p4 = scmp.eq.s32.totalorder %s760_s18, 1 }
   0xb   : > { %s1063_s22 = scalar_select %p248_p1, %s963_s15, %s250_s20  }
   0xc   : > { %p1065_p5 = por %p261_p2, %p260_p0  ;;  %p1069_p6 = por %p267_p4, %p266_p3 }
   0xd   : > { %p763_p7 = scmp.ge.s32.totalorder %s967_s16, 1  ;;  %p323_p8 = scmp.lt.s32.totalorder %s967_s16, 3 }
   0xf   : > { %p324_p9 = pnand %p763_p7, %p323_p8 }
  0x10   : > { %p364_p10 = scmp.lt.s32.totalorder (!%p324_p9), %s1048_s17, 1  ;;  %s1258_s0 = sld [smem:[#allocation5_spill]] (!%p324_p9) }
  0x11   : > { %327 = sbr.rel (%p324_p9) target bundleno = 774 (0x306), region = 60  ;;  %s1259_s1 = sld [smem:[#allocation6_spill]] (!%p324_p9) }
  0x12   : > { %s361_s18 = sand.u32 (!%p324_p9), 1, %s959_s14   ;;  %s971_s25 = smov (!%p324_p9), [#allocation2]  }
  0x16   : > { %v376_v0 = vld [vmem:[%s1245_s2 + $0x18] sm:$0xff]  ;;  %v969_v1 = vmov 0.0   ;;  %v375_v2 = vld [vmem:[%s1245_s2 + $0x10] sm:$0xff]  ;;  %vm970_vm0 = vmmov 0   ;;  %s365_s29 = scalar_select %p364_p10, %s1048_s17, 1  ;;  %v374_v3 = vld [vmem:[%s1245_s2 + $0x8] sm:$0xff] }
  0x17   : > { %805 = vmatprep.subr.mxu1 %v969_v1  ;;  %813 = vmatprep.mubr.msk.f32.mxu1 %vm970_vm0, %v969_v1  ;;  %v373_v4 = vld [vmem:[%s1245_s2] sm:$0xff]  ;;  %vm384_vm1 = vcmask 261120   ;;  %v462_v6 = vld [vmem:[%s1247_s4 + $0x18] sm:$0xff]  ;;  %v461_v7 = vld [vmem:[%s1247_s4 + $0x10] sm:$0xff] }
  0x18   : > { %806 = vmatpush3.msra.mxu1 %v376_v0  ;;  %827 = vmatprep.subr.mxu0 %v969_v1  ;;  %s765_s12 = sshll.u32 %s365_s29, 3  ;;  %v460_v8 = vld [vmem:[%s1247_s4 + $0x8] sm:$0xff]  ;;  %v459_v9 = vld [vmem:[%s1247_s4] sm:$0xff]  ;;  %v565_v11 = vld [vmem:[%s1249_s6 + $0x78] sm:$0xff] }
  0x19   : > { %807 = vmatprep.subr.mxu1 %v969_v1  ;;  %859 = vmatprep.mubr.msk.f32.mxu0 %vm970_vm0, %v969_v1  ;;  %s367_s26 = scalar_lea.vmem %s1258_s0, %s765_s12  ;;  %s371_s20 = scalar_lea.vmem %s1259_s1, %s765_s12  ;;  %v564_v12 = vld [vmem:[%s1249_s6 + $0x70] sm:$0xff]  ;;  %v563_v13 = vld [vmem:[%s1249_s6 + $0x68] sm:$0xff]  ;;  %v562_v14 = vld [vmem:[%s1249_s6 + $0x60] sm:$0xff] }
  0x1a   : > { %808 = vmatpush3.msra.mxu1 %v375_v2  ;;  %v1100_v5 = vld [vmem:[%s367_s26] sm:$0xff]  ;;  %828 = vmatpush3.msra.mxu0 %v565_v11  ;;  %v561_v15 = vld [vmem:[%s1249_s6 + $0x58] sm:$0xff]  ;;  %v560_v16 = vld [vmem:[%s1249_s6 + $0x50] sm:$0xff]  ;;  %s775_s12 = sshll.u32 %s1048_s17, 7  ;;  %s676_s1 = scalar_lea.sflag [#allocation3], %s361_s18 }
  0x1b   : > { %809 = vmatprep.subr.mxu1 %v969_v1  ;;  %v458_v10 = vld [vmem:[%s371_s20] sm:$0xff]  ;;  %829 = vmatprep.subr.mxu0 %v969_v1  ;;  %v559_v17 = vld [vmem:[%s1249_s6 + $0x48] sm:$0xff]  ;;  %v557_v19 = vld [vmem:[%s1249_s6 + $0x38] sm:$0xff]  ;;  %s764_s20 = sshll.u32 %s361_s18, 3  ;;  %s687_s0 = scalar_lea.hbm %s1253_s10, %s775_s12 }
  0x1c   : > { %810 = vmatpush3.msra.mxu1 %v374_v3  ;;  %830 = vmatpush3.msra.mxu0 %v564_v12  ;;  %v558_v18 = vld [vmem:[%s1249_s6 + $0x40] sm:$0xff]  ;;  %v556_v20 = vld [vmem:[%s1249_s6 + $0x30] sm:$0xff]  ;;  %v555_v21 = vld [vmem:[%s1249_s6 + $0x28] sm:$0xff]  ;;  %s363_s28 = scalar_lea.vmem [#allocation2], %s764_s20  ;;  %s911_s26 = sshll.u32 %s971_s25, 4  ;;  %s912_s26 = int_to_ptr.vmem [resolvable:$false] %s911_s26 }
  0x1d   : > { %811 = vmatprep.subr.mxu1 %v969_v1  ;;  %831 = vmatprep.subr.mxu0 %v969_v1  ;;  %v554_v22 = vld [vmem:[%s1249_s6 + $0x20] sm:$0xff]  ;;  %v553_v23 = vld [vmem:[%s1249_s6 + $0x18] sm:$0xff]  ;;  %v552_v24 = vld [vmem:[%s1249_s6 + $0x10] sm:$0xff]  ;;  %s689_s29 = sshll.u32 %s363_s28, 4  ;;  %s913_s17 = scalar_lea.vmem %s912_s26, 256  ;;  %s690_s29 = int_to_ptr.vmem [resolvable:$true] %s689_s29 }
  0x1e   : > { %812 = vmatpush3.msra.mxu1 %v373_v4  ;;  %832 = vmatpush3.msra.mxu0 %v563_v13  ;;  %v551_v25 = vld [vmem:[%s1249_s6 + $0x8] sm:$0xff]  ;;  %v550_v26 = vld [vmem:[%s1249_s6] sm:$0xff]  ;;  %s907_s21 = scalar_lea.vmem %s690_s29, 128  ;;  %p914_p0 = scmp.lt.s32.totalorder %s690_s29, %s912_s26 }
  0x1f   : > { %814 = vmatmul.mubr.msk.f32.vlgmr.msra.gmra.mxu1 %vm384_vm1, %v1100_v5  ;;  %816 = vmatprep.subr.mxu1 %v969_v1  ;;  %v767_v29 = vld [vmem:[%s1246_s3] ss:$0 sm:$0xff]  ;;  %p908_p11 = scmp.ne.s32.totalorder %s690_s29, %s907_s21  ;;  %p915_p1 = scmp.lt.s32.totalorder %s913_s17, %s907_s21 }
  0x20   : > { %817 = vmatpush3.msra.mxu1 %v462_v6  ;;  %824 = vmatprep.mubr.msk.f32.mxu1 %vm970_vm0, %v969_v1  ;;  %v770_v32 = vld [vmem:[%s1248_s5] ss:$0 sm:$0xff] }
  0x21   : > { %818 = vmatprep.subr.mxu1 %v969_v1  ;;  %833 = vmatprep.subr.mxu0 %v969_v1  ;;  %v771_v41 = vld [vmem:[%s1250_s7] ss:$0 sm:$0xff]  ;;  %p909_p12 = pnand %p908_p11, %p1065_p5  ;;  %p916_p2 = por %p915_p1, %p914_p0 }
  0x22   : > { %819 = vmatpush3.msra.mxu1 %v461_v7  ;;  %834 = vmatpush3.msra.mxu0 %v562_v14  ;;  %v772_v56 = vld [vmem:[%s1251_s8] ss:$0 sm:$0xff] }
  0x23   : > { %820 = vmatprep.subr.mxu1 %v969_v1  ;;  %835 = vmatprep.subr.mxu0 %v969_v1  ;;  %v773_v58 = vld [vmem:[%s1252_s9] ss:$0 sm:$0xff]  ;;  %p910_p13 = pneg %p909_p12 }
  0x24   : > { %821 = vmatpush3.msra.mxu1 %v460_v8  ;;  %836 = vmatpush3.msra.mxu0 %v561_v15 }
  0x25   : > { %822 = vmatprep.subr.mxu1 %v969_v1  ;;  %837 = vmatprep.subr.mxu0 %v969_v1  ;;  %p917_p3 = pnand %p916_p2, %p910_p13 }
  0x26   : > { %823 = vmatpush3.msra.mxu1 %v459_v9  ;;  %838 = vmatpush3.msra.mxu0 %v560_v16 }
  0x27   : > { %825 = vmatmul.mubr.msk.f32.vlgmr.msra.gmra.mxu1 %vm384_vm1, %v458_v10  ;;  %839 = vmatprep.subr.mxu0 %v969_v1 }
  0x28   : > { %840 = vmatpush3.msra.mxu0 %v559_v17 }
  0x29   : > { %841 = vmatprep.subr.mxu0 %v969_v1 }
  0x2a   : > { %842 = vmatpush3.msra.mxu0 %v558_v18 }
  0x2b   : > { %843 = vmatprep.subr.mxu0 %v969_v1 }
  0x2c   : > { %844 = vmatpush3.msra.mxu0 %v557_v19 }
  0x2d   : > { %845 = vmatprep.subr.mxu0 %v969_v1 }
  0x2e   : > { %846 = vmatpush3.msra.mxu0 %v556_v20 }
  0x2f   : > { %847 = vmatprep.subr.mxu0 %v969_v1 }
  0x30   : > { %848 = vmatpush3.msra.mxu0 %v555_v21 }
  0x31   : > { %849 = vmatprep.subr.mxu0 %v969_v1 }
  0x32   : > { %850 = vmatpush3.msra.mxu0 %v554_v22 }
  0x33   : > { %851 = vmatprep.subr.mxu0 %v969_v1 }
  0x34   : > { %852 = vmatpush3.msra.mxu0 %v553_v23 }
  0x35   : > { %853 = vmatprep.subr.mxu0 %v969_v1 }
  0x36   : > { %854 = vmatpush3.msra.mxu0 %v552_v24 }
  0x37   : > { %855 = vmatprep.subr.mxu0 %v969_v1 }
  0x38   : > { %856 = vmatpush3.msra.mxu0 %v551_v25 }
  0x39   : > { %857 = vmatprep.subr.mxu0 %v969_v1 }
  0x3a   : > { %858 = vmatpush3.msra.mxu0 %v550_v26 }
  0xdf   : > { %v454_v27 = vpop.f32.mrf.mxu1 }
  0xe0   : > { %v455_v30 = vadd.f32 %v767_v29, %v454_v27 }
  0xe1   : > { %v815_v28 = vpop.f32.mrf.mxu1 }
  0xe7   : > { %v532_v31 = vpop.f32.mrf.mxu1 }
  0xe8   : > { %v536_v33 = vadd.f32 %v532_v31, %v455_v30 }
  0xe9   : > { %v826_v34 = vpop.f32.mrf.mxu1 }
  0xea   : > { %v544_v35 = vadd.f32 %v770_v32, %v536_v33 }
  0xec   : > { %v546_v36 = vmul.f32 0.70710677, %v544_v35  ;;  %v545_v38 = vmul.f32 0.5, %v544_v35 }
  0xee   : > { %903 = verf.f32 %v546_v36 }
  0xfb   : > { %v904_v37 = vpop.eup %903 }
  0xfc   : > { %v548_v39 = vadd.f32 1.0, %v904_v37 }
  0xfe   : > { %v549_v40 = vmul.f32 %v548_v39, %v545_v38 }
 0x100   : > { %860 = vmatmul.mubr.f32.vlgmr.msra.gmra.mxu0 %v549_v40 }
 0x1c0   : > { %v639_v42 = vpop.f32.mrf.mxu0 }
 0x1c1   : > { %v640_v43 = vadd.f32 %v771_v41, %v639_v42 }
 0x1c2   : > { %v861_v44 = vpop.f32.mrf.mxu0 }
 0x1c3   : > { %v643_v45 = vadd.f32 %v640_v43, %v1100_v5 }
 0x1c5   : > { %v644_v46 = vsel %vm384_vm1, %v643_v45, 0.0 }
 0x1c6   : > { %645 = vadd.xlane.f32.xlu0 %v644_v46 }
 0x24f   : > { %v646_v47 = vpop.xlane.xlu0 %645 }
 0x250   : > { %v648_v48 = vmul.f32 0.03125, %v646_v47 }
 0x252   : > { %v649_v49 = vsub.f32 %v643_v45, %v648_v48 }
 0x254   : > { %v650_v50 = vmul.f32 %v649_v49, %v649_v49 }
 0x256   : > { %v651_v51 = vsel %vm384_vm1, %v650_v50, 0.0 }
 0x257   : > { %652 = vadd.xlane.f32.xlu0 %v651_v51 }
 0x2e0   : > { %v653_v52 = vpop.xlane.xlu0 %652 }
 0x2e1   : > { %v654_v53 = vmul.f32 0.03125, %v653_v52 }
 0x2e3   : > { %v655_v54 = vadd.f32 1e-12, %v654_v53 }
 0x2e5   : > { %905 = vrsqrt.f32 %v655_v54 }
 0x2f2   : > { %v906_v55 = vpop.eup %905 }
 0x2f3   : > { %v657_v57 = vmul.f32 %v906_v55, %v649_v49 }
 0x2f5   : > { %v665_v59 = vmul.f32 %v772_v56, %v657_v57 }
 0x2f7   : > { %v673_v60 = vadd.f32 %v773_v58, %v665_v59 }
 0x2f9   : > { %674 = vst.msk [vmem:[%s363_s28] sm:$0xff] %vm384_vm1, %v673_v60 }
 0x2fa   : > { %920 = shalt.err (!%p917_p3)
}
 0x2fb   : > { %s921_s20 = scalar_lea.hbm %s687_s0, 128  ;;  %s925_s12 = scalar_lea.hbm %s1253_s10, 256 }
 0x2fc   : > { %p922_p4 = scmp.ne.s32.totalorder %s687_s0, %s921_s20  ;;  %p926_p9 = scmp.lt.s32.totalorder %s687_s0, %s1253_s10 }
 0x2fd   : > { %p927_p10 = scmp.lt.s32.totalorder %s925_s12, %s921_s20 }
 0x2fe   : > { %p923_p7 = pnand %p922_p4, %p1065_p5 }
 0x2ff   : > { %p928_p11 = por %p927_p10, %p926_p9 }
 0x300   : > { %p924_p8 = pneg %p923_p7 }
 0x302   : > { %p929_p12 = pnand %p928_p11, %p924_p8 }
 0x304   : > { %932 = shalt.err (!%p929_p12)
}
 0x305   : > { %862 = dma.vmem_to_hbm [thread:$0]  (%p1065_p5), %s690_s29, 128, %s687_s0, %s676_s1  }
 0x306 PF: > { %p868_p13 = scmp.ge.s32.totalorder %s967_s16, 2  ;;  %s701_s11 = sand.u32 1, %s955_s13  }
 0x307   : > { %s702_s21 = scalar_lea.sflag [#allocation3], %s701_s11 }
 0x308   : > { %p865_p0 = pnand %p868_p13, %p1069_p6 }
 0x30a   : > { %p866_p1 = pneg %p865_p0 }
 0x30c   : > { %950 = dma.done.wait (%p866_p1), %s702_s21, 128  }
 0x30d   : > { %952 = vsyncadd (%p866_p1), %s702_s21, 4294967168  ;;  %p20_p2 = scmp.ge.s32.totalorder %s1052_s19, 4   ;;  %s1260_s13 = smov %s959_s14 }
 0x30e   : > { %s1261_s14 = smov %s963_s15  ;;  %s1262_s15 = smov %s1063_s22 }
 0x30f   : > { %s1263_s16 = smov %s1052_s19  ;;  %22 = sbr.rel (!%p20_p2) target bundleno = 6 (0x6), region = 98 }
 0x314   :  { %707 = vsyncpa [#allocation3], 1 }
 0x315   :  { %709 = vsyncpa [#allocation3 + $0x1], 1 }

</bundles_post_ra>
